<compile_context>
chip_gen: v5e
topology: v5e:2x2
jax: 0.10.0
libtpu: 0.0.40
codegen_flags: <defaults>
</compile_context>

<pallas_src>
import functools

import jax
import jax.numpy as jnp
from jax import lax
from jax.experimental import pallas as pl
from jax.experimental.pallas import tpu as pltpu

_EPS = 1e-12      # F.normalize eps (clamp_min)
_LANE = 128


def _round_up(x, m):
    return ((x + m - 1) // m) * m


def _pad2(a, rows, cols):
    r, c = a.shape
    return jnp.pad(a, ((0, rows - r), (0, cols - c)))


def _pick_tile(n_pad, cap):
    """Largest multiple of 128 that divides n_pad and is <= cap (min 128)."""
    m = n_pad // _LANE
    best = 1
    d = 1
    while d * d <= m:
        if m % d == 0:
            for cand in (d, m // d):
                if cand * _LANE <= cap and cand > best:
                    best = cand
        d += 1
    return best * _LANE


# ----------------------------- Pallas kernels ------------------------------ #

def _feat_vgae_kernel(x_ref, w_ref, b_ref, h_ref, *, f_pad, scale):
    """h = [ linear1(x) | normalize(linear2(x)) * scale ]  (bf16 out)."""
    h = jnp.dot(x_ref[...], w_ref[...],
                preferred_element_type=jnp.float32) + b_ref[...]
    h1 = h[:, :f_pad]                         # linear1(x)  (zero-padded cols)
    h2 = h[:, f_pad:]                         # linear2(x)
    sumsq = jnp.sum(h2 * h2, axis=1, keepdims=True)
    inv = lax.rsqrt(jnp.maximum(sumsq, _EPS * _EPS)) * scale   # EUP; clamp+scale folded
    # direct lane-aligned stores (no concatenate temporary)
    h_ref[:, :f_pad] = h1.astype(h_ref.dtype)
    h_ref[:, f_pad:] = (h2 * inv).astype(h_ref.dtype)


def _feat_gae_kernel(x_ref, w_ref, b_ref, h_ref, *, scale):
    """h = normalize(linear1(x)) * scale  (bf16 out)."""
    h = jnp.dot(x_ref[...], w_ref[...],
                preferred_element_type=jnp.float32) + b_ref[...]
    sumsq = jnp.sum(h * h, axis=1, keepdims=True)
    inv = lax.rsqrt(jnp.maximum(sumsq, _EPS * _EPS)) * scale
    h_ref[...] = (h * inv).astype(h_ref.dtype)


def _prop_kernel_resident(adj_ref, h_ref, out_ref, *, tk):
    """out = A_hat @ h with h fully VMEM-resident; accumulate into out_ref."""
    k = pl.program_id(1)

    @pl.when(k == 0)
    def _():
        out_ref[...] = jnp.zeros_like(out_ref)

    start = pl.multiple_of(k * tk, _LANE)
    hk = h_ref[pl.ds(start, tk), :]
    out_ref[...] += jnp.dot(adj_ref[...], hk, preferred_element_type=jnp.float32)


def _prop_kernel_tiled(adj_ref, h_ref, out_ref):
    """Fallback: h streamed per reduction tile; accumulate into out_ref."""
    @pl.when(pl.program_id(1) == 0)
    def _():
        out_ref[...] = jnp.zeros_like(out_ref)

    out_ref[...] += jnp.dot(adj_ref[...], h_ref[...],
                            preferred_element_type=jnp.float32)


# ------------------------------- wrapper ------------------------------------ #

def vgnae_encoder_forward(x, params, adj_hat, model="VGAE", *,
                          max_tile=1024, h_resident_budget=16 << 20):
    """Mirrors VGNAEEncoder.forward for args.model in {'GAE', 'VGAE'}."""
    if model not in ("GAE", "VGAE"):
        return x

    n, f_in = x.shape
    f_out = params["w1"].shape[1]
    f_pad = _round_up(f_out, _LANE)

    # pad N to 128 only (no quadratic tile-padding tax on adj)
    n_pad = _round_up(n, _LANE)
    # row tile: >= 2 row tiles when possible (v7x megacore), divides n_pad
    if n_pad >= 2 * _LANE:
        tm = _pick_tile(n_pad, min(max_tile, n_pad // 2))
    else:
        tm = n_pad
    tk = _pick_tile(n_pad, max_tile)

    x_p = _pad2(x.astype(jnp.float32), n_pad, f_in)
    # cast to bf16 BEFORE padding: no f32 N^2 intermediate in HBM
    adj_p = _pad2(adj_hat.astype(jnp.bfloat16), n_pad, n_pad)

    if model == "VGAE":
        w = jnp.concatenate([_pad2(params["w1"], f_in, f_pad),
                             _pad2(params["w2"], f_in, f_pad)], axis=1)
        b = jnp.concatenate([_pad2(params["b1"], 1, f_pad),
                             _pad2(params["b2"], 1, f_pad)], axis=1)
        w_h = 2 * f_pad
        feat_kernel = functools.partial(_feat_vgae_kernel, f_pad=f_pad, scale=0.4)
    else:
        w = _pad2(params["w1"], f_in, f_pad)
        b = _pad2(params["b1"], 1, f_pad)
        w_h = f_pad
        feat_kernel = functools.partial(_feat_gae_kernel, scale=1.8)

    # ---- stage 1: fused linear(s) + normalize/scale -> bf16 operand --------
    s1_bytes = (2 * tm * f_in * 4 + f_in * w_h * 4 + w_h * 4 + 2 * tm * w_h * 2)
    h = pl.pallas_call(
        feat_kernel,
        out_shape=jax.ShapeDtypeStruct((n_pad, w_h), jnp.bfloat16),
        grid=(n_pad // tm,),
        in_specs=[pl.BlockSpec((tm, f_in), lambda i: (i, 0)),
                  pl.BlockSpec((f_in, w_h), lambda i: (0, 0)),
                  pl.BlockSpec((1, w_h), lambda i: (0, 0))],
        out_specs=pl.BlockSpec((tm, w_h), lambda i: (i, 0)),
        compiler_params=pltpu.CompilerParams(
            dimension_semantics=("parallel",),
            vmem_limit_bytes=int(min(max(s1_bytes + (4 << 20), 16 << 20), 40 << 20))),
    )(x_p, w, b)

    # ---- stage 2: streamed propagation  out = A_hat @ h --------------------
    h_bytes = 2 * n_pad * w_h * 2                      # (conservative: 2 buffers)
    resident = h_bytes <= h_resident_budget

    if resident:
        prop_kernel = functools.partial(_prop_kernel_resident, tk=tk)
        h_spec = pl.BlockSpec((n_pad, w_h), lambda i, k: (0, 0))
        s2_bytes = 2 * tm * tk * 2 + h_bytes + 2 * tm * w_h * 4
    else:
        prop_kernel = _prop_kernel_tiled
        h_spec = pl.BlockSpec((tk, w_h), lambda i, k: (k, 0))
        s2_bytes = 2 * tm * tk * 2 + 2 * tk * w_h * 2 + 2 * tm * w_h * 4

    out = pl.pallas_call(
        prop_kernel,
        out_shape=jax.ShapeDtypeStruct((n_pad, w_h), jnp.float32),
        grid=(n_pad // tm, n_pad // tk),
        in_specs=[pl.BlockSpec((tm, tk), lambda i, k: (i, k)),
                  h_spec],
        out_specs=pl.BlockSpec((tm, w_h), lambda i, k: (i, 0)),
        compiler_params=pltpu.CompilerParams(
            dimension_semantics=("parallel", "arbitrary"),
            vmem_limit_bytes=int(min(max(s2_bytes + (8 << 20), 16 << 20), 40 << 20))),
    )(adj_p, h)

    if model == "VGAE":
        x_ = out[:n, :f_out]                    # propagate(linear1(x))
        mu = out[:n, f_pad:f_pad + f_out]       # propagate(norm(linear2(x))*0.4)
        return mu, x_
    return out[:n, :f_out]


# --------------------------- plain-JAX glue --------------------------------- #

def gcn_norm_dense(edge_index, num_nodes):
    """Dense D^{-1/2} (A + I) D^{-1/2} matching PyG gcn_norm with self-loops."""
    src, dst = edge_index[0], edge_index[1]
    a = jnp.zeros((num_nodes, num_nodes), jnp.float32).at[dst, src].add(1.0)
    a = a + jnp.eye(num_nodes, dtype=jnp.float32)
    deg = jnp.sum(a, axis=1)
    d_inv_sqrt = 1.0 / jnp.sqrt(deg)            # deg >= 1 via self-loops
    return a * d_inv_sqrt[:, None] * d_inv_sqrt[None, :]


def init_params(key, in_channels, out_channels):
    """nn.Linear-style init; weights stored pre-transposed (in, out)."""
    k1, k2, k3, k4 = jax.random.split(key, 4)
    bound = 1.0 / jnp.sqrt(jnp.float32(in_channels))
    return {
        "w1": jax.random.uniform(k1, (in_channels, out_channels), jnp.float32,
                                 -bound, bound),
        "b1": jax.random.uniform(k2, (1, out_channels), jnp.float32,
                                 -bound, bound),
        "w2": jax.random.uniform(k3, (in_channels, out_channels), jnp.float32,
                                 -bound, bound),
        "b2": jax.random.uniform(k4, (1, out_channels), jnp.float32,
                                 -bound, bound),
    }


if __name__ == "__main__":
    key = jax.random.PRNGKey(0)
    k_x, k_p = jax.random.split(key)

    N, IN_CH, OUT_CH = 200, 16, 32

    # node features
    x = jax.random.normal(k_x, (N, IN_CH), jnp.float32)

    # undirected ring graph, both directions listed (PyG-style edge_index)
    src = jnp.arange(N, dtype=jnp.int32)
    dst = (src + 1) % N
    edge_index = jnp.stack(
        [jnp.concatenate([src, dst]), jnp.concatenate([dst, src])], axis=0)

    adj_hat = gcn_norm_dense(edge_index, N)
    params = init_params(k_p, IN_CH, OUT_CH)

    # VGAE branch (returns (mu, x_)) and GAE branch
    mu, x_ = vgnae_encoder_forward(x, params, adj_hat, model="VGAE")
    z_gae = vgnae_encoder_forward(x, params, adj_hat, model="GAE")
    jax.block_until_ready((mu, x_, z_gae))

    # plain-JAX f32 reference
    h1 = x @ params["w1"] + params["b1"]
    h2 = x @ params["w2"] + params["b2"]
    h2n = h2 / jnp.maximum(jnp.linalg.norm(h2, axis=1, keepdims=True), _EPS) * 0.4
    h1n = h1 / jnp.maximum(jnp.linalg.norm(h1, axis=1, keepdims=True), _EPS) * 1.8
    ref_x_, ref_mu, ref_gae = adj_hat @ h1, adj_hat @ h2n, adj_hat @ h1n

    assert mu.shape == (N, OUT_CH) and x_.shape == (N, OUT_CH)
    assert z_gae.shape == (N, OUT_CH)
    assert float(jnp.max(jnp.abs(mu - ref_mu))) < 5e-2
    assert float(jnp.max(jnp.abs(x_ - ref_x_))) < 5e-2
    assert float(jnp.max(jnp.abs(z_gae - ref_gae))) < 5e-2
    print("KERNEL_OK")
</pallas_src>

<mosaic_0001>
module attributes {stable_mosaic.version = 11 : i64} {
  func.func @_feat_vgae_kernel(%arg0: i32, %arg1: memref<128x16xf32, #tpu.memory_space<vmem>>, %arg2: memref<16x256xf32, #tpu.memory_space<vmem>>, %arg3: memref<1x256xf32, #tpu.memory_space<vmem>>, %arg4: memref<128x256xbf16, #tpu.memory_space<vmem>>) attributes {dimension_semantics = [#tpu.dimension_semantics<parallel>], iteration_bounds = array<i64: 2>, scalar_prefetch = 0 : i64, scratch_operands = 0 : i64, tpu.core_type = #tpu.core_type<tc>, window_params = [{transform_indices = @transform_0, window_bounds = array<i64: 128, 16>}, {pipeline_mode = #tpu.pipeline_mode<synchronous>, transform_indices = @transform_1, window_bounds = array<i64: 16, 256>}, {pipeline_mode = #tpu.pipeline_mode<synchronous>, transform_indices = @transform_2, window_bounds = array<i64: 1, 256>}, {transform_indices = @transform_3, window_bounds = array<i64: 128, 256>}]} {
    %c0 = arith.constant 0 : index
    %c0_0 = arith.constant 0 : index
    %0 = vector.load %arg1[%c0, %c0_0] : memref<128x16xf32, #tpu.memory_space<vmem>>, vector<128x16xf32>
    %c0_1 = arith.constant 0 : index
    %c0_2 = arith.constant 0 : index
    %1 = vector.load %arg2[%c0_1, %c0_2] : memref<16x256xf32, #tpu.memory_space<vmem>>, vector<16x256xf32>
    %cst = arith.constant dense<0.000000e+00> : vector<128x256xf32>
    %2 = tpu.matmul %0, %1, %cst {dimension_numbers = #tpu.dot_dimension_numbers<[1], [0], [0], [1], [0, 0, 1, 1], [], []>} : vector<128x16xf32>, vector<16x256xf32>, vector<128x256xf32> -> vector<128x256xf32>
    %c0_3 = arith.constant 0 : index
    %c0_4 = arith.constant 0 : index
    %3 = vector.load %arg3[%c0_3, %c0_4] : memref<1x256xf32, #tpu.memory_space<vmem>>, vector<1x256xf32>
    %4 = vector.broadcast %3 : vector<1x256xf32> to vector<128x256xf32>
    %5 = arith.addf %2, %4 : vector<128x256xf32>
    %6 = vector.extract_strided_slice %5 {offsets = [0, 0], sizes = [128, 128], strides = [1, 1]} : vector<128x256xf32> to vector<128x128xf32>
    %7 = vector.extract_strided_slice %5 {offsets = [0, 128], sizes = [128, 128], strides = [1, 1]} : vector<128x256xf32> to vector<128x128xf32>
    %8 = arith.mulf %7, %7 : vector<128x128xf32>
    %cst_5 = arith.constant dense<0.000000e+00> : vector<128xf32>
    %9 = vector.multi_reduction <add>, %8, %cst_5 [1] : vector<128x128xf32> to vector<128xf32>
    %10 = vector.shape_cast %9 : vector<128xf32> to vector<128x1xf32>
    %cst_6 = arith.constant 1.000000e-24 : f32
    %11 = vector.broadcast %cst_6 : f32 to vector<128x1xf32>
    %12 = arith.maximumf %10, %11 : vector<128x1xf32>
    %13 = math.rsqrt %12 : vector<128x1xf32>
    %cst_7 = arith.constant 4.000000e-01 : f32
    %14 = vector.broadcast %cst_7 : f32 to vector<128x1xf32>
    %15 = arith.mulf %13, %14 : vector<128x1xf32>
    %16 = arith.truncf %6 : vector<128x128xf32> to vector<128x128xbf16>
    %c0_8 = arith.constant 0 : index
    %c0_9 = arith.constant 0 : index
    %17 = vector.load %arg4[%c0_8, %c0_9] : memref<128x256xbf16, #tpu.memory_space<vmem>>, vector<128x128xbf16>
    tpu.vector_store %arg4[%c0_8, %c0_9], %16 {strides = array<i32>} : memref<128x256xbf16, #tpu.memory_space<vmem>>, vector<128x128xbf16>,
    %18 = vector.broadcast %15 : vector<128x1xf32> to vector<128x128xf32>
    %19 = arith.mulf %7, %18 : vector<128x128xf32>
    %20 = arith.truncf %19 : vector<128x128xf32> to vector<128x128xbf16>
    %c0_10 = arith.constant 0 : index
    %c128 = arith.constant 128 : index
    %21 = vector.load %arg4[%c0_10, %c128] : memref<128x256xbf16, #tpu.memory_space<vmem>>, vector<128x128xbf16>
    tpu.vector_store %arg4[%c0_10, %c128], %20 {strides = array<i32>} : memref<128x256xbf16, #tpu.memory_space<vmem>>, vector<128x128xbf16>,
    return
  }
  func.func @transform_0(%arg0: i32) -> (i32, i32) {
    %c0_i32 = arith.constant 0 : i32
    %c0_i32_0 = arith.constant 0 : i32
    return %arg0, %c0_i32 : i32, i32
  }
  func.func @transform_1(%arg0: i32) -> (i32, i32) {
    %c0_i32 = arith.constant 0 : i32
    %c0_i32_0 = arith.constant 0 : i32
    %c0_i32_1 = arith.constant 0 : i32
    return %c0_i32, %c0_i32_0 : i32, i32
  }
  func.func @transform_2(%arg0: i32) -> (i32, i32) {
    %c0_i32 = arith.constant 0 : i32
    %c0_i32_0 = arith.constant 0 : i32
    %c0_i32_1 = arith.constant 0 : i32
    return %c0_i32, %c0_i32_0 : i32, i32
  }
  func.func @transform_3(%arg0: i32) -> (i32, i32) {
    %c0_i32 = arith.constant 0 : i32
    %c0_i32_0 = arith.constant 0 : i32
    return %arg0, %c0_i32 : i32, i32
  }
}

</mosaic_0001>

<bundles_post_ra>
// kernel: tpu_custom_call.1
= control target key start
LH: loop header
LB: loop body
LE: loop exit
PB: predicated region body
PF: predicated region fallthrough
CT: control target
= control target key end

     0   :  { %8 = vsyncpa [#allocation3], 0  ;;  %s1370_s0 = inlined_call_operand.vmem [shape: f32[256,16], index: 0, kind: input, shape index: {}]   ;;  %s1371_s1 = inlined_call_operand.vmem [shape: f32[16,256], index: 1, kind: input, shape index: {}]   ;;  %s1372_s2 = inlined_call_operand.vmem [shape: f32[1,256], index: 2, kind: input, shape index: {}]   ;;  %s1373_s3 = inlined_call_operand.hbm [shape: bf16[256,256], index: 3, kind: output, shape index: {}]  }
   0x1   :  { %10 = vsyncpa [#allocation3 + $0x1], 0  ;;  %s986_s12 = smov 0   ;;  %s988_s13 = smov 0  }
   0x2   :  { %s990_s14 = smov 0   ;;  %s992_s15 = smov 0  }
   0x3 LB: > { %s1007_s16 = sadd.s32 4294967295, %s962_s15   ;;  %s776_s17 = sadd.s32 4294967294, %s962_s15   ;;  %s962_s15 = sphi %s992_s15, %s1379_s15   ;;  %s958_s14 = sphi %s990_s14, %s1378_s14   ;;  %s954_s13 = sphi %s988_s13, %s1377_s13   ;;  %s950_s12 = sphi %s986_s12, %s1376_s12  }
   0x4   : > { %s1011_s18 = sadd.s32 1, %s962_s15   ;;  %s91_s19 = sadd.s32 1, %s958_s14 }
   0x5   : > { %s88_s20 = ssub.s32 %s962_s15, %s1011_s18  ;;  %p101_p0 = scmp.ne.s32.totalorder %s958_s14, %s954_s13 }
   0x6   : > { %p89_p1 = scmp.eq.s32.totalorder %s88_s20, 0  ;;  %p102_p2 = scmp.eq.s32.totalorder %s1007_s16, 1 }
   0x7   : > { %p107_p3 = scmp.ne.s32.totalorder %s954_s13, %s950_s12  ;;  %p108_p4 = scmp.eq.s32.totalorder %s776_s17, 1 }
   0x8   : > { %s1022_s21 = scalar_select %p89_p1, %s958_s14, %s91_s19  }
   0x9   : > { %p1024_p5 = por %p102_p2, %p101_p0  ;;  %p1028_p6 = por %p108_p4, %p107_p3 }
   0xa   : > { %p779_p7 = scmp.ge.s32.totalorder %s962_s15, 1  ;;  %p141_p8 = scmp.lt.s32.totalorder %s962_s15, 3 }
   0xc   : > { %p142_p9 = pnand %p779_p7, %p141_p8 }
   0xd   : > { %s781_s28 = sshll.u32 (!%p142_p9), %s1007_s16, 4  ;;  %s162_s17 = sand.u32 (!%p142_p9), 1, %s954_s13  }
   0xe   : > { %145 = sbr.rel (%p142_p9) target bundleno = 363 (0x16b), region = 32  ;;  %p166_p10 = scmp.lt.s32.totalorder (!%p142_p9), %s781_s28, 31 }
   0xf   : > { %s780_s19 = sshll.u32 (!%p142_p9), %s162_s17, 7  ;;  %s822_s24 = sshll.u32 (!%p142_p9), %s1007_s16, 7 }
  0x10   : > { %s1186_s20 = scalar_lea.vmem (!%p142_p9), [#allocation2], %s780_s19  ;;  %s710_s27 = scalar_lea.hbm (!%p142_p9), %s1373_s3, %s822_s24 }
  0x11   : > { %s711_s16 = sshll.u32 (!%p142_p9), %s1186_s20, 4  ;;  %s920_s7 = scalar_lea.hbm (!%p142_p9), %s1373_s3, 256  ;;  %s712_s16 = int_to_ptr.vmem [resolvable:$true] %s711_s16 }
  0x13   : > { %v191_v0 = vld [vmem:[%s1371_s1 + $0x18] sm:$0xff]  ;;  %v189_v1 = vld [vmem:[%s1371_s1 + $0x8] sm:$0xff]  ;;  %s1381_s28 = smov (!%p166_p10, %s781_s28), 31  ;;  %vm198_vm0 = vcmask 130048   ;;  %v190_v18 = vld [vmem:[%s1371_s1 + $0x10] sm:$0xff] }
  0x14   : > { %326 = vmatpush.msra.mxu1 %v191_v0  ;;  %825 = vmatpush.msra.mxu3 %v191_v0  ;;  %s782_s29 = sshll.u32 %s1381_s28, 3  ;;  %v188_v19 = vld [vmem:[%s1371_s1] sm:$0xff]  ;;  %s713_s28 = sshll.u32 %s710_s27, 4  ;;  %s714_s28 = int_to_ptr.hbm [resolvable:$true] %s713_s28 }
  0x15   : > { %s169_s5 = scalar_lea.vmem %s1370_s0, %s782_s29  ;;  %823 = vmatpush.msra.mxu2 %v190_v18  ;;  %261 = vmatpush.msra.mxu0 %v190_v18  ;;  %v1077_v20 = vld [vmem:[%s1372_s2] sm:$0x3]  ;;  %s698_s29 = scalar_lea.sflag [#allocation3], %s162_s17 }
  0x16   : > { %327 = vmatpush.msra.mxu1 %v189_v1  ;;  %826 = vmatpush.msra.mxu3 %v189_v1  ;;  %v172_v2 = vld [vmem:[%s169_s5] sm:$0xff]  ;;  %v173_v4 = vld [vmem:[%s169_s5 + $0x8] sm:$0xff]  ;;  %v174_v6 = vld [vmem:[%s169_s5 + $0x10] sm:$0xff]  ;;  %v1082_v21 = vperm.slane %v1077_v20, 1  ;;  %s914_s30 = sshra.s32 %s714_s28, 4  ;;  %s915_s30 = int_to_ptr.hbm [resolvable:$true] %s914_s30 }
  0x17   : > { %v180_v3 = vld [vmem:[%s169_s5 + $0x40] sm:$0xff]  ;;  %799 = vmatmul.msk.f32.vlgmr.msra.gmra.mxu1 %vm198_vm0, %v172_v2  ;;  %v181_v5 = vld [vmem:[%s169_s5 + $0x48] sm:$0xff]  ;;  %v182_v7 = vld [vmem:[%s169_s5 + $0x50] sm:$0xff]  ;;  %824 = vmatpush.msra.mxu2 %v188_v19  ;;  %s916_s4 = scalar_lea.hbm %s915_s30, 128  ;;  %p921_p0 = scmp.lt.s32.totalorder %s915_s30, %s1373_s3 }
  0x18   : > { %807 = vmatmul.msk.f32.vlgmr.msra.gmra.mxu3 %vm198_vm0, %v180_v3  ;;  %v175_v8 = vld [vmem:[%s169_s5 + $0x18] sm:$0xff]  ;;  %v176_v10 = vld [vmem:[%s169_s5 + $0x20] sm:$0xff]  ;;  %v177_v12 = vld [vmem:[%s169_s5 + $0x28] sm:$0xff]  ;;  %262 = vmatpush.msra.mxu0 %v188_v19  ;;  %p917_p11 = scmp.ne.s32.totalorder %s915_s30, %s916_s4  ;;  %p922_p1 = scmp.lt.s32.totalorder %s920_s7, %s916_s4 }
  0x19   : > { %v183_v9 = vld [vmem:[%s169_s5 + $0x58] sm:$0xff]  ;;  %v184_v11 = vld [vmem:[%s169_s5 + $0x60] sm:$0xff]  ;;  %v185_v13 = vld [vmem:[%s169_s5 + $0x68] sm:$0xff]  ;;  %791 = vmatmul.msk.f32.vlgmr.msra.gmra.mxu2 %vm198_vm0, %v180_v3  ;;  %783 = vmatmul.msk.f32.vlgmr.msra.gmra.mxu0 %vm198_vm0, %v172_v2 }
  0x1a   : > { %v178_v14 = vld [vmem:[%s169_s5 + $0x30] sm:$0xff]  ;;  %v1058_v16 = vld [vmem:[%s169_s5 + $0x38] sm:$0xff]  ;;  %p918_p12 = pnand %p917_p11, %p1024_p5  ;;  %p923_p2 = por %p922_p1, %p921_p0 }
  0x1b   : > { %v186_v15 = vld [vmem:[%s169_s5 + $0x70] sm:$0xff]  ;;  %v1060_v17 = vld [vmem:[%s169_s5 + $0x78] sm:$0xff] }
  0x1c   : > { %p919_p13 = pneg %p918_p12 }
  0x1e   : > { %p924_p3 = pnand %p923_p2, %p919_p13 }
  0x1f   : > { %800 = vmatmul.msk.f32.gmra.mxu1 %vm198_vm0, %v173_v4 }
  0x20   : > { %808 = vmatmul.msk.f32.gmra.mxu3 %vm198_vm0, %v181_v5 }
  0x21   : > { %792 = vmatmul.msk.f32.gmra.mxu2 %vm198_vm0, %v181_v5  ;;  %784 = vmatmul.msk.f32.gmra.mxu0 %vm198_vm0, %v173_v4 }
  0x27   : > { %801 = vmatmul.msk.f32.gmra.mxu1 %vm198_vm0, %v174_v6 }
  0x28   : > { %809 = vmatmul.msk.f32.gmra.mxu3 %vm198_vm0, %v182_v7 }
  0x29   : > { %793 = vmatmul.msk.f32.gmra.mxu2 %vm198_vm0, %v182_v7  ;;  %785 = vmatmul.msk.f32.gmra.mxu0 %vm198_vm0, %v174_v6  ;;  %v1180_v6 = vperm.slane %v1077_v20, 0 }
  0x2f   : > { %802 = vmatmul.msk.f32.gmra.mxu1 %vm198_vm0, %v175_v8 }
  0x30   : > { %810 = vmatmul.msk.f32.gmra.mxu3 %vm198_vm0, %v183_v9 }
  0x31   : > { %794 = vmatmul.msk.f32.gmra.mxu2 %vm198_vm0, %v183_v9  ;;  %786 = vmatmul.msk.f32.gmra.mxu0 %vm198_vm0, %v175_v8 }
  0x37   : > { %803 = vmatmul.msk.f32.gmra.mxu1 %vm198_vm0, %v176_v10 }
  0x38   : > { %811 = vmatmul.msk.f32.gmra.mxu3 %vm198_vm0, %v184_v11 }
  0x39   : > { %795 = vmatmul.msk.f32.gmra.mxu2 %vm198_vm0, %v184_v11  ;;  %787 = vmatmul.msk.f32.gmra.mxu0 %vm198_vm0, %v176_v10 }
  0x3f   : > { %804 = vmatmul.msk.f32.gmra.mxu1 %vm198_vm0, %v177_v12 }
  0x40   : > { %812 = vmatmul.msk.f32.gmra.mxu3 %vm198_vm0, %v185_v13 }
  0x41   : > { %796 = vmatmul.msk.f32.gmra.mxu2 %vm198_vm0, %v185_v13  ;;  %788 = vmatmul.msk.f32.gmra.mxu0 %vm198_vm0, %v177_v12 }
  0x47   : > { %805 = vmatmul.msk.f32.gmra.mxu1 %vm198_vm0, %v178_v14 }
  0x48   : > { %813 = vmatmul.msk.f32.gmra.mxu3 %vm198_vm0, %v186_v15 }
  0x49   : > { %797 = vmatmul.msk.f32.gmra.mxu2 %vm198_vm0, %v186_v15  ;;  %789 = vmatmul.msk.f32.gmra.mxu0 %vm198_vm0, %v178_v14 }
  0x4f   : > { %806 = vmatmul.msk.f32.gmra.mxu1 %vm198_vm0, %v1058_v16 }
  0x50   : > { %814 = vmatmul.msk.f32.gmra.mxu3 %vm198_vm0, %v1060_v17 }
  0x51   : > { %798 = vmatmul.msk.f32.gmra.mxu2 %vm198_vm0, %v1060_v17  ;;  %790 = vmatmul.msk.f32.gmra.mxu0 %vm198_vm0, %v1058_v16 }
  0x94   : > { %v329_v22 = vpop.f32.mrf.mxu1 }
  0x95   : > { %v1085_v23 = vadd.f32 %v329_v22, %v1082_v21 }
  0x96   : > { %v264_v7 = vpop.f32.mrf.mxu0 }
  0x97   : > { %v377_v24 = vmul.f32 %v1085_v23, %v1085_v23  ;;  %v265_v10 = vadd.f32 %v264_v7, %v1180_v6 }
  0x99   : > { %393 = vadd.xlane.f32.xlu0 %v377_v24  ;;  %v617_v13 = vpack.c.bf16 %v265_v10, %v265_v10 }
  0x9b   : > { %v353_v25 = vpop.f32.mrf.mxu3  ;;  %633 = vst [vmem:[%s1186_s20] sm:$0xf] %v617_v13 }
  0x9c   : > { %v1092_v26 = vadd.f32 %v353_v25, %v1082_v21  ;;  %v332_v27 = vpop.f32.mrf.mxu1  ;;  %v288_v8 = vpop.f32.mrf.mxu2 }
  0x9d   : > { %v1095_v28 = vadd.f32 %v332_v27, %v1082_v21  ;;  %v289_v11 = vadd.f32 %v288_v8, %v1180_v6 }
  0x9e   : > { %v385_v29 = vmul.f32 %v1092_v26, %v1092_v26  ;;  %v267_v18 = vpop.f32.mrf.mxu0 }
  0x9f   : > { %v378_v30 = vmul.f32 %v1095_v28, %v1095_v28  ;;  %v625_v14 = vpack.c.bf16 %v289_v11, %v289_v11 }
  0xa0   : > { %409 = vadd.xlane.f32.xlu2 %v385_v29 }
  0xa1   : > { %395 = vadd.xlane.f32.xlu0 %v378_v30  ;;  %641 = vst [vmem:[%s1186_s20 + $0x40] sm:$0xf] %v625_v14 }
  0xa3   : > { %v356_v31 = vpop.f32.mrf.mxu3 }
  0xa4   : > { %v1104_v32 = vadd.f32 %v356_v31, %v1082_v21  ;;  %v335_v33 = vpop.f32.mrf.mxu1  ;;  %v291_v17 = vpop.f32.mrf.mxu2 }
  0xa5   : > { %v1107_v34 = vadd.f32 %v335_v33, %v1082_v21  ;;  %v292_v20 = vadd.f32 %v291_v17, %v1180_v6 }
  0xa6   : > { %v386_v35 = vmul.f32 %v1104_v32, %v1104_v32 }
  0xa7   : > { %v379_v36 = vmul.f32 %v1107_v34, %v1107_v34  ;;  %v626_v27 = vpack.c.bf16 %v292_v20, %v292_v20 }
  0xa9   : > { %397 = vadd.xlane.f32.xlu1 %v379_v36  ;;  %411 = vadd.xlane.f32.xlu0 %v386_v35  ;;  %642 = vst [vmem:[%s1186_s20 + $0x48] sm:$0xf] %v626_v27  ;;  %v270_v36 = vpop.f32.mrf.mxu0 }
  0xab   : > { %v359_v37 = vpop.f32.mrf.mxu3 }
  0xac   : > { %v1116_v38 = vadd.f32 %v359_v37, %v1082_v21  ;;  %v338_v39 = vpop.f32.mrf.mxu1  ;;  %v294_v35 = vpop.f32.mrf.mxu2 }
  0xad   : > { %v1123_v42 = vadd.f32 %v338_v39, %v1082_v21 }
  0xae   : > { %v387_v40 = vmul.f32 %v1116_v38, %v1116_v38 }
  0xaf   : > { %v380_v46 = vmul.f32 %v1123_v42, %v1123_v42 }
  0xb1   : > { %413 = vadd.xlane.f32.xlu1 %v387_v40  ;;  %v273_v13 = vpop.f32.mrf.mxu0 }
  0xb2   : > { %v274_v27 = vadd.f32 %v273_v13, %v1180_v6 }
  0xb3   : > { %v362_v41 = vpop.f32.mrf.mxu3 }
  0xb4   : > { %v1126_v43 = vadd.f32 %v362_v41, %v1082_v21  ;;  %v341_v44 = vpop.f32.mrf.mxu1 }
  0xb5   : > { %v1135_v47 = vadd.f32 %v341_v44, %v1082_v21  ;;  %v295_v44 = vadd.f32 %v294_v35, %v1180_v6 }
  0xb6   : > { %v388_v45 = vmul.f32 %v1126_v43, %v1126_v43 }
  0xb7   : > { %v381_v51 = vmul.f32 %v1135_v47, %v1135_v47 }
  0xb8   : > { %415 = vadd.xlane.f32.xlu2 %v388_v45 }
  0xb9   : > { %399 = vadd.xlane.f32.xlu1 %v380_v46 }
  0xbb   : > { %v365_v48 = vpop.f32.mrf.mxu3 }
  0xbc   : > { %v1138_v49 = vadd.f32 %v365_v48, %v1082_v21  ;;  %v344_v50 = vpop.f32.mrf.mxu1 }
  0xbd   : > { %v1149_v53 = vadd.f32 %v344_v50, %v1082_v21  ;;  %v271_v50 = vadd.f32 %v270_v36, %v1180_v6 }
  0xbe   : > { %v389_v52 = vmul.f32 %v1138_v49, %v1138_v49 }
  0xbf   : > { %v382_v57 = vmul.f32 %v1149_v53, %v1149_v53 }
  0xc0   : > { %401 = vadd.xlane.f32.xlu2 %v381_v51  ;;  %417 = vadd.xlane.f32.xlu0 %v389_v52 }
  0xc3   : > { %v368_v54 = vpop.f32.mrf.mxu3 }
  0xc4   : > { %v347_v55 = vpop.f32.mrf.mxu1  ;;  %v1169_v2 = vadd.f32 %v368_v54, %v1082_v21 }
  0xc5   : > { %v1152_v56 = vadd.f32 %v347_v55, %v1082_v21  ;;  %v627_v55 = vpack.c.bf16 %v295_v44, %v295_v44 }
  0xc6   : > { %v390_v5 = vmul.f32 %v1169_v2, %v1169_v2 }
  0xc7   : > { %v383_v58 = vmul.f32 %v1152_v56, %v1152_v56  ;;  %643 = vst [vmem:[%s1186_s20 + $0x50] sm:$0xf] %v627_v55 }
  0xc8   : > { %403 = vadd.xlane.f32.xlu2 %v382_v57 }
  0xc9   : > { %405 = vadd.xlane.f32.xlu0 %v383_v58 }
  0xcb   : > { %v371_v59 = vpop.f32.mrf.mxu3 }
  0xcc   : > { %v1159_v60 = vadd.f32 %v371_v59, %v1082_v21  ;;  %v350_v61 = vpop.f32.mrf.mxu1 }
  0xcd   : > { %v1162_v62 = vadd.f32 %v350_v61, %v1082_v21 }
  0xce   : > { %v391_v63 = vmul.f32 %v1159_v60, %v1159_v60 }
  0xcf   : > { %v384_v0 = vmul.f32 %v1162_v62, %v1162_v62 }
  0xd0   : > { %421 = vadd.xlane.f32.xlu2 %v391_v63  ;;  %v619_v63 = vpack.c.bf16 %v271_v50, %v271_v50 }
  0xd1   : > { %407 = vadd.xlane.f32.xlu1 %v384_v0 }
  0xd2   : > { %635 = vst [vmem:[%s1186_s20 + $0x10] sm:$0xf] %v619_v63 }
  0xd3   : > { %v374_v1 = vpop.f32.mrf.mxu3 }
  0xd4   : > { %v1172_v3 = vadd.f32 %v374_v1, %v1082_v21  ;;  %v268_v21 = vadd.f32 %v267_v18, %v1180_v6 }
  0xd6   : > { %v392_v4 = vmul.f32 %v1172_v3, %v1172_v3  ;;  %v618_v29 = vpack.c.bf16 %v268_v21, %v268_v21 }
  0xd8   : > { %423 = vadd.xlane.f32.xlu0 %v392_v4  ;;  %634 = vst [vmem:[%s1186_s20 + $0x8] sm:$0xf] %v618_v29 }
  0xd9   : > { %419 = vadd.xlane.f32.xlu1 %v390_v5 }
 0x10c   : > { %v394_v9 = vpop.xlane.xlu0 %393 }
 0x10d   : > { %v425_v12 = vmax.f32 %v394_v9, 1e-24 }
 0x10f   : > { %868 = vrsqrt.f32 %v425_v12  ;;  %vm447_vm2 = vweird.f32 %v425_v12 }
 0x113   : > { %v410_v15 = vpop.xlane.xlu2 %409 }
 0x114   : > { %v433_v16 = vmax.f32 %v410_v15, 1e-24  ;;  %v396_v19 = vpop.xlane.xlu0 %395 }
 0x115   : > { %v869_v22 = vpop.eup %868  ;;  %v426_v24 = vmax.f32 %v396_v19, 1e-24 }
 0x116   : > { %870 = vrsqrt.f32 %v433_v16  ;;  %v442_v25 = vmul.f32 %v869_v22, %v425_v12  ;;  %vm448_vm1 = vweird.f32 %v869_v22  ;;  %vm527_vm5 = vweird.f32 %v433_v16  ;;  %v297_v12 = vpop.f32.mrf.mxu2 }
 0x117   : > { %872 = vrsqrt.f32 %v426_v24  ;;  %vm449_vm3 = vmor %vm447_vm2, %vm448_vm1  ;;  %vm457_vm8 = vweird.f32 %v426_v24  ;;  %v298_v21 = vadd.f32 %v297_v12, %v1180_v6 }
 0x118   : > { %v443_v30 = vmul.f32 %v869_v22, %v442_v25 }
 0x11a   : > { %v444_v31 = vmul.f32 0.5, %v443_v30 }
 0x11c   : > { %v871_v33 = vpop.eup %870  ;;  %v445_v37 = vsub.f32 1.5, %v444_v31  ;;  %v398_v40 = vpop.xlane.xlu1 %397  ;;  %v628_v31 = vpack.c.bf16 %v298_v21, %v298_v21 }
 0x11d   : > { %v522_v39 = vmul.f32 %v871_v33, %v433_v16  ;;  %v412_v41 = vpop.xlane.xlu0 %411  ;;  %v873_v45 = vpop.eup %872  ;;  %v1195_v46 = vmax.f32 %v398_v40, 1e-24  ;;  %vm528_vm4 = vweird.f32 %v871_v33 }
 0x11e   : > { %v1197_v48 = vmax.f32 %v412_v41, 1e-24  ;;  %v446_v51 = vmul.f32 %v869_v22, %v445_v37  ;;  %v452_v54 = vmul.f32 %v873_v45, %v426_v24  ;;  %vm458_vm6 = vweird.f32 %v873_v45  ;;  %vm529_vm7 = vmor %vm527_vm5, %vm528_vm4  ;;  %644 = vst [vmem:[%s1186_s20 + $0x58] sm:$0xf] %v628_v31  ;;  %v300_v50 = vpop.f32.mrf.mxu2 }
 0x11f   : > { %v523_v52 = vmul.f32 %v871_v33, %v522_v39  ;;  %874 = vrsqrt.f32 %v1195_v46  ;;  %vm459_vm9 = vmor %vm457_vm8, %vm458_vm6  ;;  %vm467_vm12 = vweird.f32 %v1195_v46 }
 0x120   : > { %v450_v57 = vsel %vm449_vm3, %v869_v22, %v446_v51  ;;  %v453_v59 = vmul.f32 %v873_v45, %v452_v54  ;;  %876 = vrsqrt.f32 %v1197_v48  ;;  %v276_v51 = vpop.f32.mrf.mxu0  ;;  %vm537_vm14 = vweird.f32 %v1197_v48 }
 0x121   : > { %v524_v58 = vmul.f32 0.5, %v523_v52  ;;  %v601_v61 = vmul.f32 0.4, %v450_v57  ;;  %v301_v57 = vadd.f32 %v300_v50, %v1180_v6 }
 0x122   : > { %v454_v1 = vmul.f32 0.5, %v453_v59 }
 0x123   : > { %v525_v0 = vsub.f32 1.5, %v524_v58  ;;  %v649_v4 = vmul.f32 %v601_v61, %v1085_v23  ;;  %v277_v58 = vadd.f32 %v276_v51, %v1180_v6 }
 0x124   : > { %v455_v7 = vsub.f32 1.5, %v454_v1  ;;  %v414_v8 = vpop.xlane.xlu1 %413 }
 0x125   : > { %v526_v5 = vmul.f32 %v871_v33, %v525_v0  ;;  %v875_v9 = vpop.eup %874  ;;  %v665_v10 = vpack.c.bf16 %v649_v4, %v649_v4  ;;  %v1205_v11 = vmax.f32 %v414_v8, 1e-24  ;;  %v629_v0 = vpack.c.bf16 %v301_v57, %v301_v57 }
 0x126   : > { %v877_v14 = vpop.eup %876  ;;  %v456_v17 = vmul.f32 %v873_v45, %v455_v7  ;;  %v462_v23 = vmul.f32 %v875_v9, %v1195_v46  ;;  %vm468_vm10 = vweird.f32 %v875_v9  ;;  %v621_v1 = vpack.c.bf16 %v277_v58, %v277_v58 }
 0x127   : > { %v530_v15 = vsel %vm529_vm7, %v871_v33, %v526_v5  ;;  %681 = vst [vmem:[%s1186_s20 + $0x4] sm:$0xf] %v665_v10  ;;  %v532_v16 = vmul.f32 %v877_v14, %v1197_v48  ;;  %878 = vrsqrt.f32 %v1205_v11  ;;  %vm538_vm11 = vweird.f32 %v877_v14  ;;  %vm469_vm13 = vmor %vm467_vm12, %vm468_vm10 }
 0x128   : > { %v609_v18 = vmul.f32 0.4, %v530_v15  ;;  %v460_v19 = vsel %vm459_vm9, %v873_v45, %v456_v17  ;;  %v463_v20 = vmul.f32 %v875_v9, %v462_v23  ;;  %vm539_vm15 = vmor %vm537_vm14, %vm538_vm11  ;;  %645 = vst [vmem:[%s1186_s20 + $0x60] sm:$0xf] %v629_v0  ;;  %vm547_vm1 = vweird.f32 %v1205_v11  ;;  %v303_v23 = vpop.f32.mrf.mxu2 }
 0x129   : > { %v602_v25 = vmul.f32 0.4, %v460_v19  ;;  %v533_v24 = vmul.f32 %v877_v14, %v532_v16  ;;  %637 = vst [vmem:[%s1186_s20 + $0x20] sm:$0xf] %v621_v1 }
 0x12a   : > { %v657_v22 = vmul.f32 %v609_v18, %v1092_v26  ;;  %v464_v29 = vmul.f32 0.5, %v463_v20  ;;  %v620_v26 = vpack.c.bf16 %v274_v27, %v274_v27 }
 0x12b   : > { %v416_v30 = vpop.xlane.xlu2 %415  ;;  %v650_v35 = vmul.f32 %v602_v25, %v1095_v28  ;;  %v534_v36 = vmul.f32 0.5, %v533_v24 }
 0x12c   : > { %v673_v33 = vpack.c.bf16 %v657_v22, %v657_v22  ;;  %v1216_v37 = vmax.f32 %v416_v30, 1e-24  ;;  %v465_v39 = vsub.f32 1.5, %v464_v29  ;;  %v400_v40 = vpop.xlane.xlu1 %399  ;;  %636 = vst [vmem:[%s1186_s20 + $0x18] sm:$0xf] %v620_v26  ;;  %v304_v22 = vadd.f32 %v303_v23, %v1180_v6 }
 0x12d   : > { %v879_v41 = vpop.eup %878  ;;  %v666_v44 = vpack.c.bf16 %v650_v35, %v650_v35  ;;  %v535_v45 = vsub.f32 1.5, %v534_v36  ;;  %v1223_v54 = vmax.f32 %v400_v40, 1e-24 }
 0x12e   : > { %689 = vst [vmem:[%s1186_s20 + $0x44] sm:$0xf] %v673_v33  ;;  %880 = vrsqrt.f32 %v1216_v37  ;;  %v466_v28 = vmul.f32 %v875_v9, %v465_v39  ;;  %v542_v52 = vmul.f32 %v879_v41, %v1205_v11  ;;  %vm548_vm0 = vweird.f32 %v879_v41 }
 0x12f   : > { %682 = vst [vmem:[%s1186_s20 + $0xc] sm:$0xf] %v666_v44  ;;  %v536_v55 = vmul.f32 %v877_v14, %v535_v45  ;;  %882 = vrsqrt.f32 %v1223_v54  ;;  %vm549_vm2 = vmor %vm547_vm1, %vm548_vm0  ;;  %v630_v30 = vpack.c.bf16 %v304_v22, %v304_v22  ;;  %vm557_vm4 = vweird.f32 %v1216_v37 }
 0x130   : > { %v470_v59 = vsel %vm469_vm13, %v875_v9, %v466_v28  ;;  %v543_v46 = vmul.f32 %v879_v41, %v542_v52  ;;  %v306_v52 = vpop.f32.mrf.mxu2  ;;  %vm477_vm7 = vweird.f32 %v1223_v54 }
 0x131   : > { %v603_v61 = vmul.f32 0.4, %v470_v59  ;;  %v540_v63 = vsel %vm539_vm15, %v877_v14, %v536_v55  ;;  %646 = vst [vmem:[%s1186_s20 + $0x68] sm:$0xf] %v630_v30  ;;  %v307_v0 = vadd.f32 %v306_v52, %v1180_v6 }
 0x132   : > { %v610_v4 = vmul.f32 0.4, %v540_v63  ;;  %v544_v5 = vmul.f32 0.5, %v543_v46 }
 0x133   : > { %v402_v7 = vpop.xlane.xlu2 %401  ;;  %v418_v48 = vpop.xlane.xlu0 %417  ;;  %v651_v10 = vmul.f32 %v603_v61, %v1107_v34 }
 0x134   : > { %v881_v8 = vpop.eup %880  ;;  %v1234_v12 = vmax.f32 %v402_v7, 1e-24  ;;  %v1236_v9 = vmax.f32 %v418_v48, 1e-24  ;;  %v658_v13 = vmul.f32 %v610_v4, %v1104_v32  ;;  %v545_v15 = vsub.f32 1.5, %v544_v5  ;;  %v279_v34 = vpop.f32.mrf.mxu0 }
 0x135   : > { %v552_v14 = vmul.f32 %v881_v8, %v1216_v37  ;;  %v667_v17 = vpack.c.bf16 %v651_v10, %v651_v10  ;;  %v883_v18 = vpop.eup %882  ;;  %v280_v21 = vadd.f32 %v279_v34, %v1180_v6  ;;  %vm558_vm3 = vweird.f32 %v881_v8 }
 0x136   : > { %884 = vrsqrt.f32 %v1234_v12  ;;  %v674_v16 = vpack.c.bf16 %v658_v13, %v658_v13  ;;  %v546_v19 = vmul.f32 %v879_v41, %v545_v15  ;;  %v472_v32 = vmul.f32 %v883_v18, %v1223_v54  ;;  %vm559_vm5 = vmor %vm557_vm4, %vm558_vm3 }
 0x137   : > { %v553_v20 = vmul.f32 %v881_v8, %v552_v14  ;;  %886 = vrsqrt.f32 %v1236_v9  ;;  %683 = vst [vmem:[%s1186_s20 + $0x14] sm:$0xf] %v667_v17  ;;  %v622_v29 = vpack.c.bf16 %v280_v21, %v280_v21  ;;  %vm478_vm6 = vweird.f32 %v883_v18 }
 0x138   : > { %690 = vst [vmem:[%s1186_s20 + $0x4c] sm:$0xf] %v674_v16  ;;  %v550_v11 = vsel %vm549_vm2, %v879_v41, %v546_v19  ;;  %v473_v27 = vmul.f32 %v883_v18, %v472_v32  ;;  %vm479_vm8 = vmor %vm477_vm7, %vm478_vm6  ;;  %v631_v14 = vpack.c.bf16 %v307_v0, %v307_v0  ;;  %vm487_vm11 = vweird.f32 %v1234_v12 }
 0x139   : > { %v554_v25 = vmul.f32 0.5, %v553_v20  ;;  %v611_v24 = vmul.f32 0.4, %v550_v11  ;;  %638 = vst [vmem:[%s1186_s20 + $0x28] sm:$0xf] %v622_v29  ;;  %vm567_vm13 = vweird.f32 %v1236_v9 }
 0x13a   : > { %v474_v39 = vmul.f32 0.5, %v473_v27  ;;  %647 = vst [vmem:[%s1186_s20 + $0x70] sm:$0xf] %v631_v14 }
 0x13b   : > { %v555_v31 = vsub.f32 1.5, %v554_v25  ;;  %v404_v33 = vpop.xlane.xlu2 %403  ;;  %v659_v36 = vmul.f32 %v611_v24, %v1116_v38  ;;  %v309_v25 = vpop.f32.mrf.mxu2 }
 0x13c   : > { %v1250_v35 = vpop.eup %884  ;;  %v1253_v40 = vmax.f32 %v404_v33, 1e-24  ;;  %v406_v45 = vpop.xlane.xlu0 %405  ;;  %v475_v51 = vsub.f32 1.5, %v474_v39  ;;  %v310_v39 = vadd.f32 %v309_v25, %v1180_v6 }
 0x13d   : > { %v1256_v26 = vpop.eup %886  ;;  %v556_v41 = vmul.f32 %v881_v8, %v555_v31  ;;  %v482_v44 = vmul.f32 %v1250_v35, %v1234_v12  ;;  %v675_v50 = vpack.c.bf16 %v659_v36, %v659_v36  ;;  %v282_v28 = vpop.f32.mrf.mxu0  ;;  %v1269_v46 = vmax.f32 %v406_v45, 1e-24 }
 0x13e   : > { %v562_v38 = vmul.f32 %v1256_v26, %v1236_v9  ;;  %888 = vrsqrt.f32 %v1253_v40  ;;  %v476_v58 = vmul.f32 %v883_v18, %v475_v51  ;;  %vm488_vm9 = vweird.f32 %v1250_v35 }
 0x13f   : > { %v560_v55 = vsel %vm559_vm5, %v881_v8, %v556_v41  ;;  %v483_v57 = vmul.f32 %v1250_v35, %v482_v44  ;;  %691 = vst [vmem:[%s1186_s20 + $0x54] sm:$0xf] %v675_v50  ;;  %v283_v63 = vadd.f32 %v282_v28, %v1180_v6  ;;  %890 = vrsqrt.f32 %v1269_v46  ;;  %vm489_vm12 = vmor %vm487_vm11, %vm488_vm9 }
 0x140   : > { %v612_v37 = vmul.f32 0.4, %v560_v55  ;;  %v563_v59 = vmul.f32 %v1256_v26, %v562_v38  ;;  %v480_v1 = vsel %vm479_vm8, %v883_v18, %v476_v58  ;;  %vm568_vm10 = vweird.f32 %v1256_v26 }
 0x141   : > { %v484_v61 = vmul.f32 0.5, %v483_v57  ;;  %v604_v5 = vmul.f32 0.4, %v480_v1  ;;  %v623_v8 = vpack.c.bf16 %v283_v63, %v283_v63  ;;  %vm569_vm14 = vmor %vm567_vm13, %vm568_vm10  ;;  %vm497_vm0 = vweird.f32 %v1253_v40 }
 0x142   : > { %v660_v54 = vmul.f32 %v612_v37, %v1126_v43  ;;  %v564_v4 = vmul.f32 0.5, %v563_v59  ;;  %v632_v57 = vpack.c.bf16 %v310_v39, %v310_v39  ;;  %vm507_vm3 = vweird.f32 %v1269_v46 }
 0x143   : > { %v485_v7 = vsub.f32 1.5, %v484_v61  ;;  %v422_v48 = vpop.xlane.xlu2 %421  ;;  %v652_v43 = vmul.f32 %v604_v5, %v1123_v42  ;;  %639 = vst [vmem:[%s1186_s20 + $0x30] sm:$0xf] %v623_v8 }
 0x144   : > { %v676_v10 = vpack.c.bf16 %v660_v54, %v660_v54  ;;  %v565_v13 = vsub.f32 1.5, %v564_v4  ;;  %v1277_v15 = vmax.f32 %v422_v48, 1e-24  ;;  %v889_v17 = vpop.eup %888  ;;  %v408_v23 = vpop.xlane.xlu1 %407  ;;  %648 = vst [vmem:[%s1186_s20 + $0x78] sm:$0xf] %v632_v57 }
 0x145   : > { %v486_v34 = vmul.f32 %v1250_v35, %v485_v7  ;;  %v492_v16 = vmul.f32 %v889_v17, %v1253_v40  ;;  %v285_v42 = vpop.f32.mrf.mxu0  ;;  %v668_v19 = vpack.c.bf16 %v652_v43, %v652_v43  ;;  %v1293_v12 = vmax.f32 %v408_v23, 1e-24  ;;  %v891_v32 = vpop.eup %890 }
 0x146   : > { %692 = vst [vmem:[%s1186_s20 + $0x5c] sm:$0xf] %v676_v10  ;;  %v566_v18 = vmul.f32 %v1256_v26, %v565_v13  ;;  %892 = vrsqrt.f32 %v1277_v15  ;;  %v286_v9 = vadd.f32 %v285_v42, %v1180_v6  ;;  %v502_v27 = vmul.f32 %v891_v32, %v1269_v46 }
 0x147   : > { %v490_v20 = vsel %vm489_vm12, %v1250_v35, %v486_v34  ;;  %v493_v11 = vmul.f32 %v889_v17, %v492_v16  ;;  %684 = vst [vmem:[%s1186_s20 + $0x1c] sm:$0xf] %v668_v19  ;;  %894 = vrsqrt.f32 %v1293_v12  ;;  %vm498_vm15 = vweird.f32 %v889_v17 }
 0x148   : > { %v605_v21 = vmul.f32 0.4, %v490_v20  ;;  %v570_v22 = vsel %vm569_vm14, %v1256_v26, %v566_v18  ;;  %v624_v31 = vpack.c.bf16 %v286_v9, %v286_v9  ;;  %v503_v35 = vmul.f32 %v891_v32, %v502_v27  ;;  %vm499_vm1 = vmor %vm497_vm0, %vm498_vm15 }
 0x149   : > { %v613_v24 = vmul.f32 0.4, %v570_v22  ;;  %v494_v30 = vmul.f32 0.5, %v493_v11  ;;  %vm508_vm2 = vweird.f32 %v891_v32  ;;  %vm587_vm6 = vweird.f32 %v1277_v15 }
 0x14a   : > { %v653_v29 = vmul.f32 %v605_v21, %v1135_v47  ;;  %640 = vst [vmem:[%s1186_s20 + $0x38] sm:$0xf] %v624_v31  ;;  %v504_v51 = vmul.f32 0.5, %v503_v35  ;;  %vm509_vm4 = vmor %vm507_vm3, %vm508_vm2  ;;  %vm517_vm9 = vweird.f32 %v1293_v12 }
 0x14b   : > { %v661_v33 = vmul.f32 %v613_v24, %v1138_v49  ;;  %v424_v36 = vpop.xlane.xlu0 %423  ;;  %v495_v44 = vsub.f32 1.5, %v494_v30 }
 0x14c   : > { %v893_v26 = vpop.eup %892  ;;  %v669_v41 = vpack.c.bf16 %v653_v29, %v653_v29  ;;  %v1304_v45 = vmax.f32 %v424_v36, 1e-24  ;;  %v420_v38 = vpop.xlane.xlu1 %419  ;;  %v505_v52 = vsub.f32 1.5, %v504_v51 }
 0x14d   : > { %v677_v50 = vpack.c.bf16 %v661_v33, %v661_v33  ;;  %v582_v47 = vmul.f32 %v893_v26, %v1277_v15  ;;  %v496_v28 = vmul.f32 %v889_v17, %v495_v44  ;;  %v1311_v49 = vmax.f32 %v420_v38, 1e-24  ;;  %v895_v6 = vpop.eup %894 }
 0x14e   : > { %685 = vst [vmem:[%s1186_s20 + $0x24] sm:$0xf] %v669_v41  ;;  %896 = vrsqrt.f32 %v1304_v45  ;;  %v512_v58 = vmul.f32 %v895_v6, %v1293_v12  ;;  %v506_v61 = vmul.f32 %v891_v32, %v505_v52  ;;  %vm588_vm5 = vweird.f32 %v893_v26 }
 0x14f   : > { %693 = vst [vmem:[%s1186_s20 + $0x64] sm:$0xf] %v677_v50  ;;  %v583_v55 = vmul.f32 %v893_v26, %v582_v47  ;;  %v500_v37 = vsel %vm499_vm1, %v889_v17, %v496_v28  ;;  %898 = vrsqrt.f32 %v1311_v49  ;;  %vm589_vm7 = vmor %vm587_vm6, %vm588_vm5  ;;  %vm518_vm8 = vweird.f32 %v895_v6 }
 0x150   : > { %v606_v59 = vmul.f32 0.4, %v500_v37  ;;  %v513_v63 = vmul.f32 %v895_v6, %v512_v58  ;;  %v510_v54 = vsel %vm509_vm4, %v891_v32, %v506_v61  ;;  %vm519_vm10 = vmor %vm517_vm9, %vm518_vm8  ;;  %vm597_vm12 = vweird.f32 %v1304_v45 }
 0x151   : > { %v584_v40 = vmul.f32 0.5, %v583_v55  ;;  %v607_v5 = vmul.f32 0.4, %v510_v54  ;;  %vm577_vm15 = vweird.f32 %v1311_v49 }
 0x152   : > { %v654_v0 = vmul.f32 %v606_v59, %v1149_v53  ;;  %v514_v7 = vmul.f32 0.5, %v513_v63 }
 0x153   : > { %v585_v1 = vsub.f32 1.5, %v584_v40  ;;  %v655_v13 = vmul.f32 %v607_v5, %v1152_v56 }
 0x154   : > { %v897_v4 = vpop.eup %896  ;;  %v670_v48 = vpack.c.bf16 %v654_v0, %v654_v0  ;;  %v515_v14 = vsub.f32 1.5, %v514_v7 }
 0x155   : > { %v586_v8 = vmul.f32 %v893_v26, %v585_v1  ;;  %v592_v10 = vmul.f32 %v897_v4, %v1304_v45  ;;  %v899_v46 = vpop.eup %898  ;;  %v671_v34 = vpack.c.bf16 %v655_v13, %v655_v13  ;;  %vm598_vm11 = vweird.f32 %v897_v4 }
 0x156   : > { %686 = vst [vmem:[%s1186_s20 + $0x2c] sm:$0xf] %v670_v48  ;;  %v572_v43 = vmul.f32 %v899_v46, %v1311_v49  ;;  %v516_v18 = vmul.f32 %v895_v6, %v515_v14  ;;  %vm578_vm13 = vweird.f32 %v899_v46  ;;  %vm599_vm14 = vmor %vm597_vm12, %vm598_vm11 }
 0x157   : > { %v590_v53 = vsel %vm589_vm7, %v893_v26, %v586_v8  ;;  %v593_v17 = vmul.f32 %v897_v4, %v592_v10  ;;  %687 = vst [vmem:[%s1186_s20 + $0x34] sm:$0xf] %v671_v34  ;;  %vm579_vm0 = vmor %vm577_vm15, %vm578_vm13 }
 0x158   : > { %v615_v23 = vmul.f32 0.4, %v590_v53  ;;  %v573_v16 = vmul.f32 %v899_v46, %v572_v43  ;;  %v520_v42 = vsel %vm519_vm10, %v895_v6, %v516_v18 }
 0x159   : > { %v594_v15 = vmul.f32 0.5, %v593_v17  ;;  %v608_v19 = vmul.f32 0.4, %v520_v42 }
 0x15a   : > { %v663_v56 = vmul.f32 %v615_v23, %v1159_v60  ;;  %v574_v32 = vmul.f32 0.5, %v573_v16 }
 0x15b   : > { %v595_v20 = vsub.f32 1.5, %v594_v15  ;;  %v656_v22 = vmul.f32 %v608_v19, %v1162_v62 }
 0x15c   : > { %v679_v21 = vpack.c.bf16 %v663_v56, %v663_v56  ;;  %v575_v11 = vsub.f32 1.5, %v574_v32 }
 0x15d   : > { %v596_v12 = vmul.f32 %v897_v4, %v595_v20  ;;  %v672_v9 = vpack.c.bf16 %v656_v22, %v656_v22 }
 0x15e   : > { %695 = vst [vmem:[%s1186_s20 + $0x74] sm:$0xf] %v679_v21  ;;  %v576_v25 = vmul.f32 %v899_v46, %v575_v11 }
 0x15f   : > { %v600_v60 = vsel %vm599_vm14, %v897_v4, %v596_v12  ;;  %688 = vst [vmem:[%s1186_s20 + $0x3c] sm:$0xf] %v672_v9 }
 0x160   : > { %v616_v24 = vmul.f32 0.4, %v600_v60  ;;  %v580_v62 = vsel %vm579_vm0, %v899_v46, %v576_v25 }
 0x161   : > { %v614_v29 = vmul.f32 0.4, %v580_v62 }
 0x162   : > { %v664_v27 = vmul.f32 %v616_v24, %v1172_v3 }
 0x163   : > { %v662_v31 = vmul.f32 %v614_v29, %v1169_v2 }
 0x164   : > { %v680_v30 = vpack.c.bf16 %v664_v27, %v664_v27 }
 0x165   : > { %v678_v33 = vpack.c.bf16 %v662_v31, %v662_v31 }
 0x166   : > { %696 = vst [vmem:[%s1186_s20 + $0x7c] sm:$0xf] %v680_v30 }
 0x167   : > { %694 = vst [vmem:[%s1186_s20 + $0x6c] sm:$0xf] %v678_v33 }
 0x168   : > { %927 = shalt.err (!%p924_p3)
}
 0x169   : > { %s964_s10 = smov 128   ;;  %s965_s11 = smov 8  }
 0x16a   : > { %827 = dma.vmem_to_hbm [thread:$0]  (%p1024_p5), %s712_s16, 2048, %s714_s28, %s698_s29, %s964_s10, %s964_s10, %s965_s11  }
 0x16b PF: > { %p833_p4 = scmp.ge.s32.totalorder %s962_s15, 2  ;;  %s728_s17 = sand.u32 1, %s950_s12  }
 0x16c   : > { %s729_s19 = scalar_lea.sflag [#allocation3], %s728_s17 }
 0x16d   : > { %p830_p7 = pnand %p833_p4, %p1028_p6 }
 0x16f   : > { %p831_p8 = pneg %p830_p7 }
 0x171   : > { %945 = dma.done.wait (%p831_p8), %s729_s19, 2048  }
 0x172   : > { %947 = vsyncadd (%p831_p8), %s729_s19, 4294965248  ;;  %p13_p9 = scmp.ge.s32.totalorder %s1011_s18, 4   ;;  %s1376_s12 = smov %s954_s13 }
 0x173   : > { %s1377_s13 = smov %s958_s14  ;;  %s1378_s14 = smov %s1022_s21 }
 0x174   : > { %s1379_s15 = smov %s1011_s18  ;;  %15 = sbr.rel (!%p13_p9) target bundleno = 3 (0x3), region = 67 }
 0x179   :  { %735 = vsyncpa [#allocation3], 1 }
 0x17a   :  { %737 = vsyncpa [#allocation3 + $0x1], 1 }

</bundles_post_ra>
